<compile_context>
chip_gen: v6e
topology: v6e:2x2x1
jax: 0.10.0
libtpu: 0.0.40
codegen_flags: <defaults>
</compile_context>

<pallas_src>
import functools

import jax
import jax.numpy as jnp
from jax.experimental import pallas as pl
from jax.experimental.pallas import tpu as pltpu

IN_CHANNELS = 8
INTER_CHANNELS = IN_CHANNELS // 2   # 4
GROUP = 8                           # sublane-tile aligned group size for padded channels
BN_EPS = 1e-5


# --------------------------------------------------------------------------------------
# pltpu.roll direction probe (np.roll convention vs. the opposite), measured once.
# --------------------------------------------------------------------------------------
@functools.lru_cache(maxsize=None)
def _roll_is_np_convention() -> bool:
    """True iff pltpu.roll(x, s, axis)[i] == x[(i - s) % L]  (np.roll convention)."""
    L = 128

    def probe(x_ref, o_ref):
        o_ref[...] = pltpu.roll(x_ref[...], shift=1, axis=1)

    x = jnp.tile(jnp.arange(L, dtype=jnp.float32)[None, :], (8, 1))
    y = pl.pallas_call(probe, out_shape=jax.ShapeDtypeStruct((8, L), jnp.float32))(x)
    # np.roll convention -> y[0, 0] == L-1 ; opposite convention -> y[0, 0] == 1
    return bool(jax.device_get(y)[0, 0] > L // 2)


# --------------------------------------------------------------------------------------
# Kernel
# --------------------------------------------------------------------------------------
def _make_nonlocal_kernel(shift_w1, shift_wr):
    """shift_w1 / shift_wr: pltpu.roll shifts that gather the n+1 / n+W neighbour."""

    def kernel(x_ref, mask_ref, wstk_ref, bstk_ref, weff_ref, beff_ref, z_ref):
        x = x_ref[0]                                                        # (C, N)

        # One stacked 1x1x1-conv matmul: rows = [theta(8) | phi(8) | g(8)], padded rows
        # (and padded biases) are zero.  Single bias broadcast.
        proj = jnp.dot(wstk_ref[...], x,
                       preferred_element_type=jnp.float32) + bstk_ref[...]  # (24, N)
        theta = proj[0:GROUP, :]                                            # (8, N)
        phi = proj[GROUP:2 * GROUP, :]                                      # (8, N)
        g = proj[2 * GROUP:3 * GROUP, :]                                    # (8, N)

        # MaxPool3d((1,2,2)) AFTER the conv: gather the (w+1), (h+1) and (h+1,w+1)
        # neighbours with lane rolls (XLU slot) and take the max; only anchor
        # positions (h even, w even) hold a valid window max -> selected by the mask.
        def pool2x2(v):
            v = jnp.maximum(v, pltpu.roll(v, shift=shift_w1, axis=1))       # w-neighbour
            v = jnp.maximum(v, pltpu.roll(v, shift=shift_wr, axis=1))       # h-neighbour
            return v

        phi_p = pool2x2(phi)
        g_p = pool2x2(g) * mask_ref[...]                                    # mask one factor

        # M[j, i] = sum_s phi_pool[j, s] * g_pool[i, s]   -> (8, 8)
        m = jax.lax.dot_general(phi_p, g_p, (((1,), (1,)), ((), ())),
                                preferred_element_type=jnp.float32)

        # A = W_eff @ M^T   (BN scale and 1/Ns already folded into weff)  -> (C, 8)
        a = jax.lax.dot_general(weff_ref[...], m, (((1,), (1,)), ((), ())),
                                preferred_element_type=jnp.float32)

        # z = A @ theta + b_eff + x : one matmul, one bias broadcast, one lane-dense store.
        z = jnp.dot(a, theta, preferred_element_type=jnp.float32) + beff_ref[...] + x
        z_ref[0] = z.astype(z_ref.dtype)

    return kernel


# --------------------------------------------------------------------------------------
# Parameter handling
# --------------------------------------------------------------------------------------
def init_params(key):
    """Deterministic init mimicking PyTorch defaults (uniform +-1/sqrt(fan_in)); BN affine = 0."""
    cin, ci = IN_CHANNELS, INTER_CHANNELS
    keys = jax.random.split(key, 8)

    def conv_init(kw, kb, out_c, in_c):
        bound = 1.0 / (in_c ** 0.5)
        w = jax.random.uniform(kw, (out_c, in_c), jnp.float32, -bound, bound)
        b = jax.random.uniform(kb, (out_c,), jnp.float32, -bound, bound)
        return w, b

    w_g, b_g = conv_init(keys[0], keys[1], ci, cin)
    w_theta, b_theta = conv_init(keys[2], keys[3], ci, cin)
    w_phi, b_phi = conv_init(keys[4], keys[5], ci, cin)
    w_w, b_w = conv_init(keys[6], keys[7], cin, ci)
    return dict(
        w_g=w_g, b_g=b_g,
        w_theta=w_theta, b_theta=b_theta,
        w_phi=w_phi, b_phi=b_phi,
        w_w=w_w, b_w=b_w,
        bn_gamma=jnp.zeros((cin,), jnp.float32),   # nn.init.constant_(W[1].weight, 0)
        bn_beta=jnp.zeros((cin,), jnp.float32),    # nn.init.constant_(W[1].bias, 0)
        bn_mean=jnp.zeros((cin,), jnp.float32),    # BN eval mode (running stats)
        bn_var=jnp.ones((cin,), jnp.float32),
    )


def _fold_params(params, n_s):
    """Stack theta/phi/g weights (8-row tile-aligned groups) and fold BN + 1/Ns into W."""
    def pad_rows(a, rows):
        return jnp.pad(a, ((0, rows - a.shape[0]),) + ((0, 0),) * (a.ndim - 1))

    w_stk = jnp.concatenate([pad_rows(params["w_theta"], GROUP),
                             pad_rows(params["w_phi"], GROUP),
                             pad_rows(params["w_g"], GROUP)], axis=0)              # (24, C)
    b_stk = jnp.concatenate([pad_rows(params["b_theta"][:, None], GROUP),
                             pad_rows(params["b_phi"][:, None], GROUP),
                             pad_rows(params["b_g"][:, None], GROUP)], axis=0)     # (24, 1)

    bn_scale = params["bn_gamma"] * jax.lax.rsqrt(params["bn_var"] + BN_EPS)       # (C,)
    w_eff = (params["w_w"] * bn_scale[:, None]) * (1.0 / n_s)                      # (C, Ci)
    w_eff = jnp.pad(w_eff, ((0, 0), (0, GROUP - w_eff.shape[1])))                  # (C, 8)
    b_eff = (bn_scale * (params["b_w"] - params["bn_mean"]) + params["bn_beta"])[:, None]
    return w_stk, b_stk, w_eff, b_eff


# --------------------------------------------------------------------------------------
# Forward
# --------------------------------------------------------------------------------------
@functools.partial(jax.jit, static_argnames=("np_roll",))
def _forward_impl(x, params, *, np_roll):
    x = x.astype(jnp.float32)
    B, C, T, H, W = x.shape
    if C != IN_CHANNELS or H % 2 != 0 or W % 2 != 0:
        raise ValueError("expected C == 8 and even H, W")
    N = T * H * W
    Ns = T * (H // 2) * (W // 2)

    w_stk, b_stk, w_eff, b_eff = _fold_params(params, Ns)

    # 0/1 anchor mask (h even, w even) in the flattened (t, h, w) -> n layout.
    # Built with plain XLA ops (tiny constant), streamed as a small broadcast input.
    n_idx = jnp.arange(N, dtype=jnp.int32)
    w_idx = n_idx % W
    h_idx = (n_idx // W) % H
    mask = jnp.broadcast_to(
        (((w_idx % 2) == 0) & ((h_idx % 2) == 0)).astype(jnp.float32)[None, :],
        (GROUP, N))

    # Forward-gather roll shifts for the n+1 and n+W neighbours (convention probed).
    s1 = (N - 1) if np_roll else 1
    sw = (N - W) if np_roll else W

    x_flat = x.reshape(B, C, N)   # free reshape; no transposes anywhere

    def const_spec(shape):
        nd = len(shape)
        return pl.BlockSpec(shape, lambda b: (0,) * nd)

    # TODO(synk): for very large N (e.g. > ~50k on v7x's 64 MiB VMEM) add an Ns grid
    # axis with a two-pass (M-accumulate then z) structure; whole-sample blocks are
    # used here since the test shapes are tiny.
    z_flat = pl.pallas_call(
        _make_nonlocal_kernel(s1, sw),
        out_shape=jax.ShapeDtypeStruct((B, C, N), jnp.float32),
        grid_spec=pltpu.PrefetchScalarGridSpec(
            num_scalar_prefetch=0,
            grid=(B,),
            in_specs=[
                pl.BlockSpec((1, C, N), lambda b: (b, 0, 0)),   # x, streamed once
                const_spec(mask.shape),
                const_spec(w_stk.shape),
                const_spec(b_stk.shape),
                const_spec(w_eff.shape),
                const_spec(b_eff.shape),
            ],
            out_specs=pl.BlockSpec((1, C, N), lambda b: (b, 0, 0)),
        ),
        compiler_params=pltpu.CompilerParams(
            dimension_semantics=("parallel",),
            vmem_limit_bytes=64 * 1024 * 1024,
        ),
    )(x_flat, mask, w_stk, b_stk, w_eff, b_eff)

    return z_flat.reshape(B, C, T, H, W)


def nonlocal_block(x, params):
    """x: (B, Cin, T, H, W) float32 (PyTorch NCTHW). Returns the same shape."""
    return _forward_impl(x, params, np_roll=_roll_is_np_convention())


# --------------------------------------------------------------------------------------
# Pure-JAX reference (BN in eval mode with running stats) and self-test
# --------------------------------------------------------------------------------------
def _reference(x, p):
    B, C, T, H, W = x.shape
    Ci = INTER_CHANNELS

    def conv1(t, w, b):
        return jnp.einsum('bcthw,oc->bothw', t, w) + b[None, :, None, None, None]

    def pool(t):
        b_, c_, t_, h_, w_ = t.shape
        return t.reshape(b_, c_, t_, h_ // 2, 2, w_ // 2, 2).max(axis=(4, 6))

    g_x = pool(conv1(x, p['w_g'], p['b_g'])).reshape(B, Ci, -1).transpose(0, 2, 1)
    theta_x = conv1(x, p['w_theta'], p['b_theta']).reshape(B, Ci, -1).transpose(0, 2, 1)
    phi_x = pool(conv1(x, p['w_phi'], p['b_phi'])).reshape(B, Ci, -1)
    f = theta_x @ phi_x
    f = f / f.shape[-1]
    y = (f @ g_x).transpose(0, 2, 1).reshape(B, Ci, T, H, W)
    wy = conv1(y, p['w_w'], p['b_w'])
    br = lambda v: v[None, :, None, None, None]
    bn = br(p['bn_gamma']) * (wy - br(p['bn_mean'])) * jax.lax.rsqrt(br(p['bn_var']) + BN_EPS) + br(p['bn_beta'])
    return bn + x


if __name__ == "__main__":
    key = jax.random.PRNGKey(0)
    kx, kp, kbn = jax.random.split(key, 3)

    B, C, T, H, W = 2, IN_CHANNELS, 4, 8, 8           # N = T*H*W = 256 (lane-dense)
    x = jax.random.normal(kx, (B, C, T, H, W), dtype=jnp.float32)

    # 1) Module-default init (BN gamma = beta = 0  =>  W_y == 0 and z == x, as in PyTorch).
    params = init_params(kp)
    z = jax.block_until_ready(nonlocal_block(x, params))
    assert z.shape == x.shape
    assert jnp.allclose(z, _reference(x, params), atol=1e-4), "mismatch vs reference (default init)"
    assert jnp.allclose(z, x, atol=1e-5), "z != x under zero-initialized BN affine"

    # 2) Non-degenerate BN parameters to actually exercise the whole non-local path.
    k1, k2, k3, k4 = jax.random.split(kbn, 4)
    params2 = dict(params)
    params2.update(
        bn_gamma=jax.random.normal(k1, (C,), jnp.float32),
        bn_beta=jax.random.normal(k2, (C,), jnp.float32),
        bn_mean=0.1 * jax.random.normal(k3, (C,), jnp.float32),
        bn_var=jax.nn.softplus(jax.random.normal(k4, (C,), jnp.float32)) + 0.5,
    )
    z2 = jax.block_until_ready(nonlocal_block(x, params2))
    assert jnp.allclose(z2, _reference(x, params2), atol=1e-3, rtol=1e-4), \
        "mismatch vs reference (non-degenerate BN)"

    print("KERNEL_OK")
</pallas_src>

<mosaic_0001>
module attributes {stable_mosaic.version = 11 : i64} {
  func.func @probe(%arg0: memref<8x128xf32, #tpu.memory_space<vmem>>, %arg1: memref<8x128xf32, #tpu.memory_space<vmem>>) attributes {dimension_semantics = [], scalar_prefetch = 0 : i64, scratch_operands = 0 : i64, tpu.core_type = #tpu.core_type<tc>} {
    %c0 = arith.constant 0 : index
    %c0_0 = arith.constant 0 : index
    %0 = vector.load %arg0[%c0, %c0_0] : memref<8x128xf32, #tpu.memory_space<vmem>>, vector<8x128xf32>
    %c1_i32 = arith.constant 1 : i32
    %1 = tpu.dynamic_rotate %0 by %c1_i32 dim 1 : vector<8x128xf32>, i32 -> vector<8x128xf32>
    %c0_1 = arith.constant 0 : index
    %c0_2 = arith.constant 0 : index
    %2 = vector.load %arg1[%c0_1, %c0_2] : memref<8x128xf32, #tpu.memory_space<vmem>>, vector<8x128xf32>
    tpu.vector_store %arg1[%c0_1, %c0_2], %1 {strides = array<i32>} : memref<8x128xf32, #tpu.memory_space<vmem>>, vector<8x128xf32>,
    return
  }
}

</mosaic_0001>

<bundles_post_ra>
// kernel: tpu_custom_call.1
= control target key start
LH: loop header
LB: loop body
LE: loop exit
PB: predicated region body
PF: predicated region fallthrough
CT: control target
= control target key end

     0   :  { %6 = vsyncpa [#allocation3], 0  ;;  %s106_s0 = inlined_call_operand.hbm [shape: f32[8,128], index: 0, kind: input, shape index: {}]   ;;  %s107_s1 = inlined_call_operand.hbm [shape: f32[8,128], index: 1, kind: output, shape index: {}]  }
   0x1   :  { %7 = vsyncpa [#allocation4], 0  ;;  %s87_s6 = smov [#allocation2]  }
   0x2   :  { %s14_s7 = sshll.u32 %s87_s6, 4  ;;  %s15_s7 = int_to_ptr.vmem [resolvable:$true] %s14_s7 }
   0x3   :  { %s51_s8 = scalar_lea.vmem %s15_s7, 128  ;;  %p56_p1 = scmp.lt.s32.totalorder %s15_s7, %s15_s7 }
   0x4   :  { %p52_p0 = scmp.ne.s32.totalorder %s15_s7, %s51_s8  ;;  %p57_p2 = scmp.lt.s32.totalorder %s51_s8, %s51_s8 }
   0x6   :  { %p58_p3 = por %p57_p2, %p56_p1 }
   0x8   :  { %p59_p4 = pnand %p58_p3, %p52_p0 }
   0xa   :  { %62 = shalt.err (!%p59_p4)
}
   0xb   :  { %17 = dma.hbm_to_vmem [thread:$0]  %s106_s0, 128, %s15_s7, [#allocation3]  }
   0xc   :  { %83 = dma.done.wait [#allocation3], 128  }
   0xd   :  { %84 = vsyncadd [#allocation3], 4294967168  ;;  %v21_v0 = vld [vmem:[#allocation2] sm:$0xff]  ;;  %s88_s11 = smov 1   ;;  %s89_s12 = smov [#allocation5]  }
   0xe   :  { %22 = vrot.lane.b32.xlu0 %v21_v0, %s88_s11  ;;  %s31_s13 = sshll.u32 %s89_s12, 4  ;;  %s32_s13 = int_to_ptr.vmem [resolvable:$true] %s31_s13 }
   0xf   :  { %s63_s14 = scalar_lea.vmem %s32_s13, 128  ;;  %p68_p6 = scmp.lt.s32.totalorder %s32_s13, %s32_s13 }
  0x10   :  { %p64_p5 = scmp.ne.s32.totalorder %s32_s13, %s63_s14  ;;  %p69_p7 = scmp.lt.s32.totalorder %s63_s14, %s63_s14 }
  0x12   :  { %p70_p8 = por %p69_p7, %p68_p6 }
  0x14   :  { %p71_p9 = pnand %p70_p8, %p64_p5 }
  0x80   :  { %v23_v1 = vpop.permute.xlu0 %22 }
  0x81   :  { %24 = vst [vmem:[#allocation5] sm:$0xff] %v23_v1 }
  0x82   :  { %74 = shalt.err (!%p71_p9)
}
  0x83   :  { %34 = dma.vmem_to_hbm [thread:$0]  %s32_s13, 128, %s107_s1, [#allocation4]  }
  0x84   :  { %85 = dma.done.wait [#allocation4], 128  }
  0x85   :  { %86 = vsyncadd [#allocation4], 4294967168 }
  0x86   :  { %38 = vsyncpa [#allocation3], 1 }
  0x87   :  { %39 = vsyncpa [#allocation4], 1 }

</bundles_post_ra>
